<compile_context>
chip_gen: v5e
topology: v5e:2x2
jax: 0.10.0
libtpu: 0.0.40
codegen_flags: <defaults>
</compile_context>

<pallas_src>
import jax
import jax.numpy as jnp
from jax.experimental import pallas as pl
from jax.experimental.pallas import tpu as pltpu


def _bbox_1x1_kernel(x_ref, w_ref, b_ref, o_ref):
    # x_ref: (Cin, TS), w_ref: (Cout, Cin), b_ref: (Cout, 1), o_ref: (Cout, TS)
    acc = jnp.dot(w_ref[...], x_ref[...], preferred_element_type=jnp.float32)
    o_ref[...] = (acc + b_ref[...]).astype(o_ref.dtype)


def _round_up(x, m):
    return pl.cdiv(x, m) * m


def conv1x1_nchw(x3d, w_oc_ic, b, *, max_spatial_tile=2048):
    """1x1 conv in native NCHW layout.

    x3d:     (N, Cin, S)  activations (S = H*W), any float dtype
    w_oc_ic: (Cout, Cin)  conv weight, PyTorch (Cout, Cin, 1, 1) squeezed
    b:       (Cout,)      bias
    returns  (N, Cout, S)
    """
    N, Cin, S = x3d.shape
    Cout = w_oc_ic.shape[0]

    # Lane-dense spatial tile: multiple of 128, as large as reasonable.
    ts = min(max_spatial_tile, _round_up(S, 128))
    grid = (N, pl.cdiv(S, ts))

    b2d = b.reshape(Cout, 1)

    itemsize = jnp.dtype(x3d.dtype).itemsize
    cost = pl.CostEstimate(
        flops=2 * N * S * Cin * Cout,
        transcendentals=0,
        bytes_accessed=itemsize * (N * S * Cin + N * S * Cout + Cin * Cout + Cout),
    )

    return pl.pallas_call(
        _bbox_1x1_kernel,
        out_shape=jax.ShapeDtypeStruct((N, Cout, S), x3d.dtype),
        grid_spec=pl.GridSpec(
            grid=grid,
            in_specs=[
                # activation tile: (Cin, ts) -- native layout, read once
                pl.BlockSpec((pl.Squeezed(), Cin, ts), lambda n, s: (n, 0, s)),
                # weight and bias: tiny, resident across all grid steps
                pl.BlockSpec((Cout, Cin), lambda n, s: (0, 0)),
                pl.BlockSpec((Cout, 1), lambda n, s: (0, 0)),
            ],
            # lane-dense output: last dim is the spatial tile (multiple of 128)
            out_specs=pl.BlockSpec((pl.Squeezed(), Cout, ts), lambda n, s: (n, 0, s)),
        ),
        compiler_params=pltpu.CompilerParams(
            dimension_semantics=("parallel", "parallel"),
        ),
        cost_estimate=cost,
    )(x3d, w_oc_ic, b2d)


def bbox_head_forward(x_nchw, w_oc_ic, b, num_anchors):
    """x_nchw: (N, Cin, H, W); w_oc_ic: (Cout, Cin); b: (Cout,).

    Returns (N, H*W*num_anchors, 4), matching the PyTorch module.
    """
    N, Cin, H, W = x_nchw.shape
    S = H * W
    Cout = num_anchors * 4
    assert w_oc_ic.shape == (Cout, Cin)

    # Pure reshape (no data movement): NCHW -> (N, Cin, S).
    x3d = x_nchw.reshape(N, Cin, S)

    y = conv1x1_nchw(x3d, w_oc_ic, b)            # (N, Cout, S)

    # Small output re-layout (Cout = 4A << Cin): (N, Cout, S) -> (N, S, Cout)
    # -> (N, S*A, 4) == PyTorch permute(0,2,3,1).view(N, -1, 4).
    return jnp.transpose(y, (0, 2, 1)).reshape(N, S * num_anchors, 4)


if __name__ == "__main__":
    key = jax.random.PRNGKey(0)
    k_x, k_w, k_b = jax.random.split(key, 3)

    # Small shapes consistent with the module: inchannels=32, num_anchors=3.
    N, Cin, H, W = 2, 32, 16, 16
    num_anchors = 3
    Cout = num_anchors * 4  # 12

    x = jax.random.normal(k_x, (N, Cin, H, W), dtype=jnp.float32)
    # PyTorch Conv2d weight is (Cout, Cin, 1, 1); keep it as (Cout, Cin).
    w = jax.random.normal(k_w, (Cout, Cin), dtype=jnp.float32) * 0.05
    b = jax.random.normal(k_b, (Cout,), dtype=jnp.float32) * 0.01

    out = bbox_head_forward(x, w, b, num_anchors)
    jax.block_until_ready(out)

    # Reference in plain JAX: same math as PyTorch 1x1 conv + permute + view.
    ref = (
        jnp.transpose(x, (0, 2, 3, 1)).reshape(N * H * W, Cin) @ w.T + b
    ).reshape(N, H * W * num_anchors, 4)

    assert out.shape == (N, H * W * num_anchors, 4)
    assert jnp.allclose(out, ref, atol=1e-4, rtol=1e-4)

    print("KERNEL_OK")
</pallas_src>

<mosaic_0001>
module attributes {stable_mosaic.version = 11 : i64} {
  func.func @_bbox_1x1_kernel(%arg0: i32, %arg1: i32, %arg2: memref<1x32x256xf32, #tpu.memory_space<vmem>>, %arg3: memref<12x32xf32, #tpu.memory_space<vmem>>, %arg4: memref<12x1xf32, #tpu.memory_space<vmem>>, %arg5: memref<1x12x256xf32, #tpu.memory_space<vmem>>) attributes {dimension_semantics = [#tpu.dimension_semantics<parallel>, #tpu.dimension_semantics<parallel>], iteration_bounds = array<i64: 2, 1>, scalar_prefetch = 0 : i64, scratch_operands = 0 : i64, tpu.core_type = #tpu.core_type<tc>, window_params = [{transform_indices = @transform_0, window_bounds = array<i64: 1, 32, 256>}, {pipeline_mode = #tpu.pipeline_mode<synchronous>, transform_indices = @transform_1, window_bounds = array<i64: 12, 32>}, {pipeline_mode = #tpu.pipeline_mode<synchronous>, transform_indices = @transform_2, window_bounds = array<i64: 12, 1>}, {transform_indices = @transform_3, window_bounds = array<i64: 1, 12, 256>}]} {
    %c0 = arith.constant 0 : index
    %c0_0 = arith.constant 0 : index
    %0 = vector.load %arg3[%c0, %c0_0] : memref<12x32xf32, #tpu.memory_space<vmem>>, vector<12x32xf32>
    %c0_1 = arith.constant 0 : index
    %c0_2 = arith.constant 0 : index
    %c0_3 = arith.constant 0 : index
    %1 = vector.load %arg2[%c0_1, %c0_2, %c0_3] : memref<1x32x256xf32, #tpu.memory_space<vmem>>, vector<1x32x256xf32>
    %2 = vector.shape_cast %1 : vector<1x32x256xf32> to vector<32x256xf32>
    %cst = arith.constant dense<0.000000e+00> : vector<12x256xf32>
    %3 = tpu.matmul %0, %2, %cst {dimension_numbers = #tpu.dot_dimension_numbers<[1], [0], [0], [1], [0, 0, 1, 1], [], []>} : vector<12x32xf32>, vector<32x256xf32>, vector<12x256xf32> -> vector<12x256xf32>
    %c0_4 = arith.constant 0 : index
    %c0_5 = arith.constant 0 : index
    %4 = vector.load %arg4[%c0_4, %c0_5] : memref<12x1xf32, #tpu.memory_space<vmem>>, vector<12x1xf32>
    %5 = vector.broadcast %4 : vector<12x1xf32> to vector<12x256xf32>
    %6 = arith.addf %3, %5 : vector<12x256xf32>
    %c0_6 = arith.constant 0 : index
    %c0_7 = arith.constant 0 : index
    %c0_8 = arith.constant 0 : index
    %7 = vector.load %arg5[%c0_6, %c0_7, %c0_8] : memref<1x12x256xf32, #tpu.memory_space<vmem>>, vector<1x12x256xf32>
    %8 = vector.shape_cast %7 : vector<1x12x256xf32> to vector<12x256xf32>
    %9 = vector.shape_cast %6 : vector<12x256xf32> to vector<1x12x256xf32>
    tpu.vector_store %arg5[%c0_6, %c0_7, %c0_8], %9 {strides = array<i32>} : memref<1x12x256xf32, #tpu.memory_space<vmem>>, vector<1x12x256xf32>,
    return
  }
  func.func @transform_0(%arg0: i32, %arg1: i32) -> (i32, i32, i32) {
    %c0_i32 = arith.constant 0 : i32
    %c0_i32_0 = arith.constant 0 : i32
    return %arg0, %c0_i32, %arg1 : i32, i32, i32
  }
  func.func @transform_1(%arg0: i32, %arg1: i32) -> (i32, i32) {
    %c0_i32 = arith.constant 0 : i32
    %c0_i32_0 = arith.constant 0 : i32
    %c0_i32_1 = arith.constant 0 : i32
    return %c0_i32, %c0_i32_0 : i32, i32
  }
  func.func @transform_2(%arg0: i32, %arg1: i32) -> (i32, i32) {
    %c0_i32 = arith.constant 0 : i32
    %c0_i32_0 = arith.constant 0 : i32
    %c0_i32_1 = arith.constant 0 : i32
    return %c0_i32, %c0_i32_0 : i32, i32
  }
  func.func @transform_3(%arg0: i32, %arg1: i32) -> (i32, i32, i32) {
    %c0_i32 = arith.constant 0 : i32
    %c0_i32_0 = arith.constant 0 : i32
    return %arg0, %c0_i32, %arg1 : i32, i32, i32
  }
}

</mosaic_0001>

<bundles_post_ra>
// kernel: tpu_custom_call.1
= control target key start
LH: loop header
LB: loop body
LE: loop exit
PB: predicated region body
PF: predicated region fallthrough
CT: control target
= control target key end

     0   :  { %8 = vsyncpa [#allocation3], 0  ;;  %s686_s0 = inlined_call_operand.hbm [shape: f32[2,32,256], index: 0, kind: input, shape index: {}]   ;;  %s687_s1 = inlined_call_operand.vmem [shape: f32[12,32], index: 1, kind: input, shape index: {}]   ;;  %s688_s2 = inlined_call_operand.vmem [shape: f32[12,1], index: 2, kind: input, shape index: {}]   ;;  %s689_s3 = inlined_call_operand.vmem [shape: f32[2,12,256], index: 3, kind: output, shape index: {}]  }
   0x1   :  { %10 = vsyncpa [#allocation3 + $0x1], 0  ;;  %s586_s12 = smov 0   ;;  %s588_s13 = smov 0  }
   0x2   :  { %s590_s14 = smov 0   ;;  %s592_s15 = smov 0  }
   0x3   :  { %s594_s16 = smov 0   ;;  %s596_s17 = smov 0  }
   0x4 LB: > { %s395_s18 = sadd.s32 4294967295, %s561_s17   ;;  %s28_s19 = sadd.s32 1, %s557_s16  ;;  %s561_s17 = sphi %s596_s17, %s16_s17   ;;  %s557_s16 = sphi %s594_s16, %s696_s16   ;;  %s553_s15 = sphi %s592_s15, %s695_s15   ;;  %s549_s14 = sphi %s590_s14, %s694_s14   ;;  %s545_s13 = sphi %s588_s13, %s693_s13   ;;  %s541_s12 = sphi %s586_s12, %s692_s12  }
   0x5   : > { %p30_p0 = scmp.ge.s32.totalorder %s28_s19, 2  ;;  %s37_s20 = sadd.s32 1, %s549_s14 }
   0x6   : > { %p44_p1 = scmp.ne.s32.totalorder %s549_s14, %s545_s13  ;;  %p45_p2 = scmp.eq.s32.totalorder %s561_s17, 0 }
   0x7   : > { %s698_s19 = smov (%p30_p0, %s28_s19), 0  ;;  %p50_p4 = scmp.ne.s32.totalorder %s545_s13, %s541_s12 }
   0x8   : > { %p622_p3 = por %p45_p2, %p44_p1  ;;  %s32_s22 = ssub.s32 %s557_s16, %s698_s19 }
   0x9   : > { %p51_p5 = scmp.eq.s32.totalorder %s395_s18, 0  ;;  %p35_p6 = scmp.eq.s32.totalorder %s32_s22, 0 }
   0xa   : > { %p428_p8 = scmp.lt.s32.totalorder %s561_s17, 2  ;;  %s150_s25 = sand.u32 1, %s549_s14  }
   0xb   : > { %p629_p7 = por %p51_p5, %p50_p4  ;;  %s412_s26 = sshll.u32 %s557_s16, 6 }
   0xc   : > { %s635_s24 = scalar_select %p35_p6, %s549_s14, %s37_s20  }
   0xd   : > { %s399_s27 = sshll.u32 %s150_s25, 6  ;;  %s161_s30 = scalar_lea.hbm %s686_s0, %s412_s26 }
   0xe   : > { %s162_s4 = sshll.u32 %s161_s30, 4  ;;  %s154_s5 = scalar_lea.vmem [#allocation2], %s399_s27  ;;  %s163_s4 = int_to_ptr.hbm [resolvable:$true] %s162_s4 }
   0xf   : > { %s164_s6 = sshll.u32 %s154_s5, 4  ;;  %p425_p9 = pnand %p428_p8, %p622_p3  ;;  %s165_s6 = int_to_ptr.vmem [resolvable:$true] %s164_s6 }
  0x10   : > { %p402_p10 = scmp.ge.s32.totalorder %s561_s17, 1  ;;  %p172_p11 = scmp.lt.s32.totalorder %s561_s17, 3 }
  0x11   : > { %s151_s7 = scalar_lea.sflag [#allocation3], %s150_s25  ;;  %s563_s8 = smov 256  }
  0x12   : > { %s564_s9 = smov 16   ;;  %p173_p12 = pnand %p402_p10, %p172_p11 }
  0x13   : > { %427 = dma.hbm_to_vmem [thread:$0]  (!%p425_p9), %s163_s4, 1024, %s165_s6, %s151_s7, %s563_s8, %s563_s8, %s564_s9  }
  0x14   : > { %176 = sbr.rel (%p173_p12) target bundleno = 172 (0xac), region = 32  ;;  %s178_s10 = sand.u32 (!%p173_p12), 1, %s545_s13  }
  0x15   : > { %s403_s11 = sshll.u32 (!%p173_p12), %s178_s10, 6  ;;  %s179_s12 = scalar_lea.sflag (!%p173_p12), [#allocation3], %s178_s10 }
  0x16   : > { %s182_s18 = scalar_lea.vmem (!%p173_p12), [#allocation2], %s403_s11 }
  0x19   : > { %536 = dma.done.wait (%p629_p7), %s179_s12, 1024  }
  0x1a   : > { %538 = vsyncadd (%p629_p7), %s179_s12, 4294966272  ;;  %v565_v0 = vmov 0   ;;  %v229_v1 = vld [vmem:[%s182_s18 + $0x30] sm:$0xff]  ;;  %v230_v2 = vld [vmem:[%s182_s18 + $0x38] sm:$0xff]  ;;  %vm243_vm0 = vcmask 261120   ;;  %p212_p13 = scmp.lt.s32.totalorder %s553_s15, 1 }
  0x1b   : > { %480 = vset.pattern.permute.xlu0 %v565_v0  ;;  %v227_v3 = vld [vmem:[%s182_s18 + $0x20] sm:$0xff]  ;;  %262 = vmatpush.msra.mxu0 %v229_v1  ;;  %v228_v4 = vld [vmem:[%s182_s18 + $0x28] sm:$0xff]  ;;  %v225_v5 = vld [vmem:[%s182_s18 + $0x10] sm:$0xff] }
  0x1c   : > { %414 = vmatpush.msra.mxu2 %v229_v1  ;;  %285 = vmatpush.msra.mxu1 %v230_v2  ;;  %v226_v6 = vld [vmem:[%s182_s18 + $0x18] sm:$0xff]  ;;  %v223_v7 = vld [vmem:[%s182_s18] sm:$0xff]  ;;  %v224_v8 = vld [vmem:[%s182_s18 + $0x8] sm:$0xff]  ;;  %s700_s15 = smov (!%p212_p13, %s553_s15), 1 }
  0x1d   : > { %418 = vmatpush.msra.mxu3 %v230_v2  ;;  %263 = vmatpush.msra.mxu0 %v227_v3  ;;  %v221_v9 = vld [vmem:[%s687_s1] sm:$0xff]  ;;  %v222_v10 = vld [vmem:[%s687_s1 + $0x8] sm:$0xf]  ;;  %s413_s29 = sshll.u32 %s700_s15, 5 }
  0x1e   : > { %415 = vmatpush.msra.mxu2 %v227_v3  ;;  %286 = vmatpush.msra.mxu1 %v228_v4  ;;  %v231_v11 = vld [vmem:[%s688_s2] sm:$0xff]  ;;  %v232_v12 = vld [vmem:[%s688_s2 + $0x8] sm:$0xf]  ;;  %s219_s5 = scalar_lea.vmem %s689_s3, %s413_s29 }
  0x1f   : > { %419 = vmatpush.msra.mxu3 %v228_v4  ;;  %264 = vmatpush.msra.mxu0 %v225_v5 }
  0x20   : > { %416 = vmatpush.msra.mxu2 %v225_v5  ;;  %287 = vmatpush.msra.mxu1 %v226_v6 }
  0x21   : > { %420 = vmatpush.msra.mxu3 %v226_v6  ;;  %265 = vmatpush.msra.mxu0 %v223_v7 }
  0x22   : > { %417 = vmatpush.msra.mxu2 %v223_v7  ;;  %288 = vmatpush.msra.mxu1 %v224_v8 }
  0x23   : > { %421 = vmatpush.msra.mxu3 %v224_v8  ;;  %406 = vmatmul.msk.f32.vlgmr.msra.gmra.mxu0 %vm243_vm0, %v221_v9 }
  0x24   : > { %407 = vmatmul.msk.f32.vlgmr.msra.gmra.mxu2 %vm243_vm0, %v222_v10  ;;  %408 = vmatmul.msk.f32.vlgmr.msra.gmra.mxu1 %vm243_vm0, %v221_v9 }
  0x25   : > { %409 = vmatmul.msk.f32.vlgmr.msra.gmra.mxu3 %vm243_vm0, %v222_v10  ;;  %235 = vperm.xlu0 %480, %v231_v11  }
  0x2d   : > { %240 = vperm.xlu0 %480, %v232_v12  }
  0x97   : > { %v236_v13 = vpop.permute.xlu0 %235 }
  0x9f   : > { %v241_v18 = vpop.permute.xlu0 %240 }
  0xa0   : > { %v267_v14 = vpop.f32.mrf.mxu0 }
  0xa1   : > { %v268_v15 = vadd.f32 %v267_v14, %v236_v13  ;;  %v290_v16 = vpop.f32.mrf.mxu1 }
  0xa2   : > { %v291_v17 = vadd.f32 %v290_v16, %v236_v13 }
  0xa3   : > { %296 = vst [vmem:[%s219_s5] sm:$0xff] %v268_v15 }
  0xa4   : > { %297 = vst [vmem:[%s219_s5 + $0x8] sm:$0xff] %v291_v17 }
  0xa7   : > { %v270_v19 = vpop.f32.mrf.mxu2 }
  0xa8   : > { %v271_v20 = vadd.f32 %v270_v19, %v241_v18  ;;  %v293_v21 = vpop.f32.mrf.mxu3 }
  0xa9   : > { %v294_v22 = vadd.f32 %v293_v21, %v241_v18 }
  0xaa   : > { %298 = vst [vmem:[%s219_s5 + $0x10] sm:$0xf] %v271_v20 }
  0xab   : > { %299 = vst [vmem:[%s219_s5 + $0x18] sm:$0xf] %v294_v22 }
  0xac PF: > { %s16_s17 = sadd.s32 1, %s561_s17   ;;  %s692_s12 = smov %s545_s13 }
  0xad   : > { %p13_p0 = scmp.ge.s32.totalorder %s16_s17, 4   ;;  %s693_s13 = smov %s549_s14 }
  0xae   : > { %s694_s14 = smov %s635_s24  ;;  %s695_s15 = smov %s557_s16 }
  0xaf   : > { %s696_s16 = smov %s698_s19  ;;  %15 = sbr.rel (!%p13_p0) target bundleno = 4 (0x4), region = 72 }
  0xb4   :  { %330 = vsyncpa [#allocation3], 1 }
  0xb5   :  { %332 = vsyncpa [#allocation3 + $0x1], 1 }

</bundles_post_ra>
